<compile_context>
chip_gen: v5e
topology: v5e:2x2
jax: 0.10.0
libtpu: 0.0.40
codegen_flags: <defaults>
</compile_context>

<pallas_src>
import functools

import jax
import jax.numpy as jnp
from jax.experimental import pallas as pl
from jax.experimental.pallas import tpu as pltpu


def _round_up(n, m):
    return ((n + m - 1) // m) * m


# ---------------------------------------------------------------------------
# Kernels (weights already in (in, out) layout -> plain NN matmuls on MXU).
# ---------------------------------------------------------------------------
def _head_kernel_pred(x_ref, w1_ref, b1_ref, w2_ref, b2_ref, pred_ref):
    x = x_ref[...]
    h = jnp.dot(x, w1_ref[...], preferred_element_type=jnp.float32)
    h = h + b1_ref[...]
    pred = jnp.dot(h.astype(w2_ref.dtype), w2_ref[...],
                   preferred_element_type=jnp.float32)
    pred = pred + b2_ref[...]
    pred_ref[...] = pred.astype(pred_ref.dtype)


def _head_kernel_pred_feat(x_ref, w1_ref, b1_ref, w2_ref, b2_ref,
                           pred_ref, feat_ref):
    x = x_ref[...]
    h = jnp.dot(x, w1_ref[...], preferred_element_type=jnp.float32)
    h = h + b1_ref[...]
    feat_ref[...] = h.astype(feat_ref.dtype)
    pred = jnp.dot(h.astype(w2_ref.dtype), w2_ref[...],
                   preferred_element_type=jnp.float32)
    pred = pred + b2_ref[...]
    pred_ref[...] = pred.astype(pred_ref.dtype)


def _vmem_capacity_bytes():
    try:
        return int(pltpu.get_tpu_info().vmem_capacity_bytes)
    except Exception:
        return 64 << 20   # conservative fallback (v7x per-TC VMEM)


# ---------------------------------------------------------------------------
# Public factory: one-time parameter prep + a jitted forward(x, get_feat).
# ---------------------------------------------------------------------------
def make_frequency_classifier_head(w1, b1, w2, b2, *, compute_dtype=None,
                                   block_b=256):
    """Weights in PyTorch layout: w1 (in_dim, in_dim), w2 (num_classes, in_dim);
    b1 (in_dim,), b2 (num_classes,).  Returns forward(x, get_feat=False)."""
    D = int(w1.shape[0])
    C = int(w2.shape[0])
    assert w1.shape == (D, D) and b1.shape == (D,)
    assert w2.shape == (C, D) and b2.shape == (C,)

    cdt = jnp.dtype(compute_dtype) if compute_dtype is not None else jnp.dtype(w1.dtype)

    # Lane-dense padding of both the feature (D) and class (C) dims to 128.
    Dp = _round_up(D, 128)
    Cp = _round_up(C, 128)

    # One-time prep: transpose to (in, out), zero-pad, cast, reshape biases.
    # Hot path never rewrites weights in HBM again.
    w1t = jnp.pad(jnp.asarray(w1, cdt).T, ((0, Dp - D), (0, Dp - D)))
    w2t = jnp.pad(jnp.asarray(w2, cdt).T, ((0, Dp - D), (0, Cp - C)))
    b1p = jnp.pad(jnp.asarray(b1, cdt), ((0, Dp - D),)).reshape(1, Dp)
    b2p = jnp.pad(jnp.asarray(b2, cdt), ((0, Cp - C),)).reshape(1, Cp)

    c_isz = jnp.dtype(cdt).itemsize
    vmem_cap = _vmem_capacity_bytes()

    @functools.partial(jax.jit, static_argnames=("get_feat",))
    def forward(x, get_feat=False):
        B, D_in = x.shape
        assert D_in == D, f"expected in_dim={D}, got {D_in}"
        out_dtype = x.dtype
        xc = x.astype(cdt)

        # Batch tile: one big 8-aligned tile for small B; block_b rows for
        # large B (no forced tiny splits that starve single-TC parts).
        tb = max(8, min(_round_up(B, 8), _round_up(int(block_b), 8)))
        Bp = _round_up(B, tb)
        if (Bp, Dp) != (B, D):
            xc = jnp.pad(xc, ((0, Bp - B), (0, Dp - D)))
        grid = (Bp // tb,)

        out_isz = jnp.dtype(out_dtype).itemsize
        # Per-buffer bytes x actual buffer count (weights/biases: 1 buffer).
        weight_bytes = (Dp * Dp + Dp * Cp + 8 * Dp + 8 * Cp) * c_isz
        stream_bytes = 2 * tb * Dp * c_isz                    # x tile, 2 bufs
        out_bytes = 2 * tb * Cp * out_isz                     # pred tile, 2 bufs
        if get_feat:
            out_bytes += 2 * tb * Dp * out_isz                # feat tile, 2 bufs
        scratch_bytes = tb * (Dp + Cp) * 4                    # f32 intermediates
        vmem_limit = int(min(
            max(weight_bytes + stream_bytes + out_bytes + scratch_bytes + (4 << 20),
                16 << 20),
            vmem_cap - (16 << 20)))                           # leave compiler headroom

        resident = pl.Buffered(1)   # grid-invariant: no re-DMA, single buffer
        in_specs = [
            pl.BlockSpec((tb, Dp), lambda i: (i, 0)),                          # x tile
            pl.BlockSpec((Dp, Dp), lambda i: (0, 0), pipeline_mode=resident),  # W1 (in,out)
            pl.BlockSpec((1, Dp), lambda i: (0, 0), pipeline_mode=resident),   # b1
            pl.BlockSpec((Dp, Cp), lambda i: (0, 0), pipeline_mode=resident),  # W2 (in,out)
            pl.BlockSpec((1, Cp), lambda i: (0, 0), pipeline_mode=resident),   # b2
        ]
        compiler_params = pltpu.CompilerParams(
            dimension_semantics=("parallel",),
            vmem_limit_bytes=vmem_limit,
        )
        cost = pl.CostEstimate(
            flops=2 * Bp * Dp * (Dp + Cp),
            transcendentals=0,
            bytes_accessed=(Bp * Dp * c_isz
                            + (Dp * Dp + Dp * Cp + Dp + Cp) * c_isz
                            + Bp * Cp * out_isz
                            + (Bp * Dp * out_isz if get_feat else 0)),
        )

        if get_feat:
            pred, feat = pl.pallas_call(
                _head_kernel_pred_feat,
                out_shape=(
                    jax.ShapeDtypeStruct((Bp, Cp), out_dtype),
                    jax.ShapeDtypeStruct((Bp, Dp), out_dtype),
                ),
                grid_spec=pltpu.PrefetchScalarGridSpec(
                    num_scalar_prefetch=0,
                    grid=grid,
                    in_specs=in_specs,
                    out_specs=[
                        pl.BlockSpec((tb, Cp), lambda i: (i, 0)),
                        pl.BlockSpec((tb, Dp), lambda i: (i, 0)),
                    ],
                ),
                compiler_params=compiler_params,
                cost_estimate=cost,
            )(xc, w1t, b1p, w2t, b2p)
            return pred[:B, :C], feat[:B, :D]

        pred = pl.pallas_call(
            _head_kernel_pred,
            out_shape=jax.ShapeDtypeStruct((Bp, Cp), out_dtype),
            grid_spec=pltpu.PrefetchScalarGridSpec(
                num_scalar_prefetch=0,
                grid=grid,
                in_specs=in_specs,
                out_specs=pl.BlockSpec((tb, Cp), lambda i: (i, 0)),
            ),
            compiler_params=compiler_params,
            cost_estimate=cost,
        )(xc, w1t, b1p, w2t, b2p)
        return pred[:B, :C]

    return forward


if __name__ == "__main__":
    # Small shapes; B=10 deliberately not a multiple of 8 (exercises batch
    # padding), D=32 and C=10 exercise the lane-pad-to-128 paths for both
    # the feat and pred outputs.
    B, in_dim, num_classes = 10, 32, 10

    key = jax.random.PRNGKey(0)
    kx, k1, k2, k3, k4 = jax.random.split(key, 5)
    bound = 1.0 / float(jnp.sqrt(in_dim))
    x = jax.random.normal(kx, (B, in_dim), jnp.float32)
    w1 = jax.random.uniform(k1, (in_dim, in_dim), jnp.float32, -bound, bound)
    b1 = jax.random.uniform(k2, (in_dim,), jnp.float32, -bound, bound)
    w2 = jax.random.uniform(k3, (num_classes, in_dim), jnp.float32, -bound, bound)
    b2 = jax.random.uniform(k4, (num_classes,), jnp.float32, -bound, bound)

    # f32 compute for a strict check (pass compute_dtype=jnp.bfloat16 for the
    # faster MXU-native inference path; tolerance then loosens to ~1e-2 rel).
    head = make_frequency_classifier_head(w1, b1, w2, b2)

    pred, feat = head(x, get_feat=True)
    pred_only = head(x, get_feat=False)
    jax.block_until_ready((pred, feat, pred_only))

    # Reference check in plain JAX (same math as the PyTorch forward).
    feat_ref = x @ w1.T + b1
    pred_ref = feat_ref @ w2.T + b2
    assert pred.shape == (B, num_classes) and feat.shape == (B, in_dim)
    assert jnp.allclose(feat, feat_ref, atol=1e-4, rtol=1e-4)
    assert jnp.allclose(pred, pred_ref, atol=1e-4, rtol=1e-4)
    assert jnp.allclose(pred_only, pred, atol=1e-6, rtol=1e-6)

    print("KERNEL_OK")
</pallas_src>

<mosaic_0001>
module attributes {stable_mosaic.version = 11 : i64} {
  func.func @_head_kernel_pred_feat(%arg0: i32, %arg1: memref<16x128xf32, #tpu.memory_space<vmem>>, %arg2: memref<128x128xf32, #tpu.memory_space<vmem>>, %arg3: memref<1x128xf32, #tpu.memory_space<vmem>>, %arg4: memref<128x128xf32, #tpu.memory_space<vmem>>, %arg5: memref<1x128xf32, #tpu.memory_space<vmem>>, %arg6: memref<16x128xf32, #tpu.memory_space<vmem>>, %arg7: memref<16x128xf32, #tpu.memory_space<vmem>>) attributes {dimension_semantics = [#tpu.dimension_semantics<parallel>], iteration_bounds = array<i64: 1>, scalar_prefetch = 0 : i64, scratch_operands = 0 : i64, tpu.core_type = #tpu.core_type<tc>, window_params = [{transform_indices = @transform_0, window_bounds = array<i64: 16, 128>}, {pipeline_mode = #tpu.pipeline_mode<synchronous>, transform_indices = @transform_1, window_bounds = array<i64: 128, 128>}, {pipeline_mode = #tpu.pipeline_mode<synchronous>, transform_indices = @transform_2, window_bounds = array<i64: 1, 128>}, {pipeline_mode = #tpu.pipeline_mode<synchronous>, transform_indices = @transform_3, window_bounds = array<i64: 128, 128>}, {pipeline_mode = #tpu.pipeline_mode<synchronous>, transform_indices = @transform_4, window_bounds = array<i64: 1, 128>}, {transform_indices = @transform_5, window_bounds = array<i64: 16, 128>}, {transform_indices = @transform_6, window_bounds = array<i64: 16, 128>}]} {
    %c0 = arith.constant 0 : index
    %c0_0 = arith.constant 0 : index
    %0 = vector.load %arg1[%c0, %c0_0] : memref<16x128xf32, #tpu.memory_space<vmem>>, vector<16x128xf32>
    %c0_1 = arith.constant 0 : index
    %c0_2 = arith.constant 0 : index
    %1 = vector.load %arg2[%c0_1, %c0_2] : memref<128x128xf32, #tpu.memory_space<vmem>>, vector<128x128xf32>
    %cst = arith.constant dense<0.000000e+00> : vector<16x128xf32>
    %2 = tpu.matmul %0, %1, %cst {dimension_numbers = #tpu.dot_dimension_numbers<[1], [0], [0], [1], [0, 0, 1, 1], [], []>} : vector<16x128xf32>, vector<128x128xf32>, vector<16x128xf32> -> vector<16x128xf32>
    %c0_3 = arith.constant 0 : index
    %c0_4 = arith.constant 0 : index
    %3 = vector.load %arg3[%c0_3, %c0_4] : memref<1x128xf32, #tpu.memory_space<vmem>>, vector<1x128xf32>
    %4 = vector.broadcast %3 : vector<1x128xf32> to vector<16x128xf32>
    %5 = arith.addf %2, %4 : vector<16x128xf32>
    %c0_5 = arith.constant 0 : index
    %c0_6 = arith.constant 0 : index
    %6 = vector.load %arg7[%c0_5, %c0_6] : memref<16x128xf32, #tpu.memory_space<vmem>>, vector<16x128xf32>
    tpu.vector_store %arg7[%c0_5, %c0_6], %5 {strides = array<i32>} : memref<16x128xf32, #tpu.memory_space<vmem>>, vector<16x128xf32>,
    %c0_7 = arith.constant 0 : index
    %c0_8 = arith.constant 0 : index
    %7 = vector.load %arg4[%c0_7, %c0_8] : memref<128x128xf32, #tpu.memory_space<vmem>>, vector<128x128xf32>
    %cst_9 = arith.constant dense<0.000000e+00> : vector<16x128xf32>
    %8 = tpu.matmul %5, %7, %cst_9 {dimension_numbers = #tpu.dot_dimension_numbers<[1], [0], [0], [1], [0, 0, 1, 1], [], []>} : vector<16x128xf32>, vector<128x128xf32>, vector<16x128xf32> -> vector<16x128xf32>
    %c0_10 = arith.constant 0 : index
    %c0_11 = arith.constant 0 : index
    %9 = vector.load %arg5[%c0_10, %c0_11] : memref<1x128xf32, #tpu.memory_space<vmem>>, vector<1x128xf32>
    %10 = vector.broadcast %9 : vector<1x128xf32> to vector<16x128xf32>
    %11 = arith.addf %8, %10 : vector<16x128xf32>
    %c0_12 = arith.constant 0 : index
    %c0_13 = arith.constant 0 : index
    %12 = vector.load %arg6[%c0_12, %c0_13] : memref<16x128xf32, #tpu.memory_space<vmem>>, vector<16x128xf32>
    tpu.vector_store %arg6[%c0_12, %c0_13], %11 {strides = array<i32>} : memref<16x128xf32, #tpu.memory_space<vmem>>, vector<16x128xf32>,
    return
  }
  func.func @transform_0(%arg0: i32) -> (i32, i32) {
    %c0_i32 = arith.constant 0 : i32
    %c0_i32_0 = arith.constant 0 : i32
    return %arg0, %c0_i32 : i32, i32
  }
  func.func @transform_1(%arg0: i32) -> (i32, i32) {
    %c0_i32 = arith.constant 0 : i32
    %c0_i32_0 = arith.constant 0 : i32
    %c0_i32_1 = arith.constant 0 : i32
    return %c0_i32, %c0_i32_0 : i32, i32
  }
  func.func @transform_2(%arg0: i32) -> (i32, i32) {
    %c0_i32 = arith.constant 0 : i32
    %c0_i32_0 = arith.constant 0 : i32
    %c0_i32_1 = arith.constant 0 : i32
    return %c0_i32, %c0_i32_0 : i32, i32
  }
  func.func @transform_3(%arg0: i32) -> (i32, i32) {
    %c0_i32 = arith.constant 0 : i32
    %c0_i32_0 = arith.constant 0 : i32
    %c0_i32_1 = arith.constant 0 : i32
    return %c0_i32, %c0_i32_0 : i32, i32
  }
  func.func @transform_4(%arg0: i32) -> (i32, i32) {
    %c0_i32 = arith.constant 0 : i32
    %c0_i32_0 = arith.constant 0 : i32
    %c0_i32_1 = arith.constant 0 : i32
    return %c0_i32, %c0_i32_0 : i32, i32
  }
  func.func @transform_5(%arg0: i32) -> (i32, i32) {
    %c0_i32 = arith.constant 0 : i32
    %c0_i32_0 = arith.constant 0 : i32
    return %arg0, %c0_i32 : i32, i32
  }
  func.func @transform_6(%arg0: i32) -> (i32, i32) {
    %c0_i32 = arith.constant 0 : i32
    %c0_i32_0 = arith.constant 0 : i32
    return %arg0, %c0_i32 : i32, i32
  }
}

</mosaic_0001>

<bundles_post_ra>
// kernel: forward.1
= control target key start
LH: loop header
LB: loop body
LE: loop exit
PB: predicated region body
PF: predicated region fallthrough
CT: control target
= control target key end

     0   :  { %12 = vsyncpa [#allocation3], 0  ;;  %s407_s0 = inlined_call_operand.vmem [shape: f32[16,128], index: 0, kind: input, shape index: {}]   ;;  %s408_s1 = inlined_call_operand.hbm [shape: f32[128,128], index: 1, kind: input, shape index: {}]   ;;  %s409_s2 = inlined_call_operand.vmem [shape: f32[1,128], index: 2, kind: input, shape index: {}]   ;;  %s410_s3 = inlined_call_operand.hbm [shape: f32[128,128], index: 3, kind: input, shape index: {}]   ;;  %s411_s4 = inlined_call_operand.vmem [shape: f32[1,128], index: 4, kind: input, shape index: {}]   ;;  %s412_s5 = inlined_call_operand.hbm [shape: f32[16,128], index: 5, kind: output, shape index: {0}]   ;;  %s413_s6 = inlined_call_operand.hbm [shape: f32[16,128], index: 6, kind: output, shape index: {1}]  }
   0x1   :  { %13 = vsyncpa [#allocation6], 0 }
   0x2   :  { %14 = vsyncpa [#allocation4], 0 }
   0x3   :  { %15 = vsyncpa [#allocation9], 0  ;;  %s22_s23 = sshll.u32 %s408_s1, 4  ;;  %s330_s24 = smov [#allocation2]   ;;  %s23_s23 = int_to_ptr.hbm [resolvable:$true] %s22_s23 }
   0x4   :  { %s24_s25 = sshll.u32 %s330_s24, 4  ;;  %s37_s28 = sshll.u32 %s410_s3, 4  ;;  %s25_s25 = int_to_ptr.vmem [resolvable:$true] %s24_s25  ;;  %s38_s28 = int_to_ptr.hbm [resolvable:$true] %s37_s28 }
   0x5   :  { %s331_s29 = smov 128   ;;  %s332_s30 = smov 8  }
   0x6   :  { %30 = dma.hbm_to_vmem [thread:$0]  %s23_s23, 2048, %s25_s25, [#allocation3], %s331_s29, %s331_s29, %s332_s30  }
   0x7   :  { %s333_s7 = smov [#allocation5]  }
   0x8   :  { %s39_s8 = sshll.u32 %s333_s7, 4  ;;  %s40_s8 = int_to_ptr.vmem [resolvable:$true] %s39_s8 }
   0x9   :  { %45 = dma.hbm_to_vmem [thread:$0]  %s38_s28, 2048, %s40_s8, [#allocation6], %s331_s29, %s331_s29, %s332_s30  }
   0xa   :  { %322 = dma.done.wait [#allocation3], 2048  }
   0xb   :  { %323 = vsyncadd [#allocation3], 4294965248 }
   0xc   :  { %324 = dma.done.wait [#allocation6], 2048  }
   0xd   :  { %325 = vsyncadd [#allocation6], 4294965248  ;;  %v73_v0 = vld [vmem:[#allocation2 + $0x78] sm:$0xff]  ;;  %v72_v1 = vld [vmem:[#allocation2 + $0x70] sm:$0xff]  ;;  %s334_s12 = smov [#allocation8]   ;;  %s167_s16 = sshll.u32 %s413_s6, 4  ;;  %s168_s16 = int_to_ptr.hbm [resolvable:$true] %s167_s16 }
   0xe   :  { %186 = vmatpush.msra.mxu2 %v73_v0  ;;  %78 = vmatpush.msra.mxu0 %v73_v0  ;;  %v71_v2 = vld [vmem:[#allocation2 + $0x68] sm:$0xff]  ;;  %v70_v3 = vld [vmem:[#allocation2 + $0x60] sm:$0xff]  ;;  %v69_v4 = vld [vmem:[#allocation2 + $0x58] sm:$0xff]  ;;  %s165_s13 = sshll.u32 %s334_s12, 4  ;;  %s335_s18 = smov [#allocation7]   ;;  %s166_s13 = int_to_ptr.vmem [resolvable:$true] %s165_s13 }
   0xf   :  { %v118_v5 = vld [vmem:[#allocation5 + $0x78] sm:$0xff]  ;;  %v117_v6 = vld [vmem:[#allocation5 + $0x70] sm:$0xff]  ;;  %v116_v8 = vld [vmem:[#allocation5 + $0x68] sm:$0xff]  ;;  %s152_s19 = sshll.u32 %s335_s18, 4  ;;  %s154_s22 = sshll.u32 %s412_s5, 4  ;;  %s153_s19 = int_to_ptr.vmem [resolvable:$true] %s152_s19  ;;  %s155_s22 = int_to_ptr.hbm [resolvable:$true] %s154_s22 }
  0x10   :  { %187 = vmatpush.msra.mxu2 %v72_v1  ;;  %79 = vmatpush.msra.mxu0 %v72_v1  ;;  %v68_v7 = vld [vmem:[#allocation2 + $0x50] sm:$0xff]  ;;  %v67_v9 = vld [vmem:[#allocation2 + $0x48] sm:$0xff]  ;;  %v115_v10 = vld [vmem:[#allocation5 + $0x60] sm:$0xff] }
  0x11   :  { %202 = vmatpush.msra.mxu3 %v118_v5  ;;  %123 = vmatpush.msra.mxu1 %v118_v5  ;;  %v66_v11 = vld [vmem:[#allocation2 + $0x40] sm:$0xff]  ;;  %v114_v12 = vld [vmem:[#allocation5 + $0x58] sm:$0xff]  ;;  %v113_v14 = vld [vmem:[#allocation5 + $0x50] sm:$0xff] }
  0x12   :  { %188 = vmatpush.msra.mxu2 %v71_v2  ;;  %80 = vmatpush.msra.mxu0 %v71_v2  ;;  %v65_v13 = vld [vmem:[#allocation2 + $0x38] sm:$0xff]  ;;  %v64_v15 = vld [vmem:[#allocation2 + $0x30] sm:$0xff]  ;;  %v112_v16 = vld [vmem:[#allocation5 + $0x48] sm:$0xff] }
  0x13   :  { %203 = vmatpush.msra.mxu3 %v117_v6  ;;  %124 = vmatpush.msra.mxu1 %v117_v6  ;;  %v63_v17 = vld [vmem:[#allocation2 + $0x28] sm:$0xff]  ;;  %v111_v18 = vld [vmem:[#allocation5 + $0x40] sm:$0xff]  ;;  %v110_v20 = vld [vmem:[#allocation5 + $0x38] sm:$0xff] }
  0x14   :  { %189 = vmatpush.msra.mxu2 %v70_v3  ;;  %81 = vmatpush.msra.mxu0 %v70_v3  ;;  %v62_v19 = vld [vmem:[#allocation2 + $0x20] sm:$0xff]  ;;  %v61_v21 = vld [vmem:[#allocation2 + $0x18] sm:$0xff]  ;;  %v109_v22 = vld [vmem:[#allocation5 + $0x30] sm:$0xff] }
  0x15   :  { %204 = vmatpush.msra.mxu3 %v116_v8  ;;  %125 = vmatpush.msra.mxu1 %v116_v8  ;;  %v60_v23 = vld [vmem:[#allocation2 + $0x10] sm:$0xff]  ;;  %v108_v24 = vld [vmem:[#allocation5 + $0x28] sm:$0xff]  ;;  %v107_v26 = vld [vmem:[#allocation5 + $0x20] sm:$0xff] }
  0x16   :  { %190 = vmatpush.msra.mxu2 %v69_v4  ;;  %82 = vmatpush.msra.mxu0 %v69_v4  ;;  %v59_v25 = vld [vmem:[#allocation2 + $0x8] sm:$0xff]  ;;  %v58_v27 = vld [vmem:[#allocation2] sm:$0xff]  ;;  %v106_v30 = vld [vmem:[#allocation5 + $0x18] sm:$0xff] }
  0x17   :  { %205 = vmatpush.msra.mxu3 %v115_v10  ;;  %126 = vmatpush.msra.mxu1 %v115_v10  ;;  %v57_v28 = vld [vmem:[%s407_s0 + $0x8] sm:$0xff]  ;;  %v56_v29 = vld [vmem:[%s407_s0] sm:$0xff]  ;;  %v105_v31 = vld [vmem:[#allocation5 + $0x10] sm:$0xff] }
  0x18   :  { %191 = vmatpush.msra.mxu2 %v68_v7  ;;  %83 = vmatpush.msra.mxu0 %v68_v7  ;;  %v104_v32 = vld [vmem:[#allocation5 + $0x8] sm:$0xff]  ;;  %v103_v33 = vld [vmem:[#allocation5] sm:$0xff] }
  0x19   :  { %206 = vmatpush.msra.mxu3 %v114_v12  ;;  %127 = vmatpush.msra.mxu1 %v114_v12  ;;  %v224_v34 = vld [vmem:[%s409_s2] ss:$0 sm:$0xff] }
  0x1a   :  { %192 = vmatpush.msra.mxu2 %v67_v9  ;;  %84 = vmatpush.msra.mxu0 %v67_v9  ;;  %v225_v39 = vld [vmem:[%s411_s4] ss:$0 sm:$0xff] }
  0x1b   :  { %207 = vmatpush.msra.mxu3 %v113_v14  ;;  %128 = vmatpush.msra.mxu1 %v113_v14 }
  0x1c   :  { %193 = vmatpush.msra.mxu2 %v66_v11  ;;  %85 = vmatpush.msra.mxu0 %v66_v11 }
  0x1d   :  { %208 = vmatpush.msra.mxu3 %v112_v16  ;;  %129 = vmatpush.msra.mxu1 %v112_v16 }
  0x1e   :  { %194 = vmatpush.msra.mxu2 %v65_v13  ;;  %86 = vmatpush.msra.mxu0 %v65_v13 }
  0x1f   :  { %209 = vmatpush.msra.mxu3 %v111_v18  ;;  %130 = vmatpush.msra.mxu1 %v111_v18 }
  0x20   :  { %195 = vmatpush.msra.mxu2 %v64_v15  ;;  %87 = vmatpush.msra.mxu0 %v64_v15 }
  0x21   :  { %210 = vmatpush.msra.mxu3 %v110_v20  ;;  %131 = vmatpush.msra.mxu1 %v110_v20 }
  0x22   :  { %196 = vmatpush.msra.mxu2 %v63_v17  ;;  %88 = vmatpush.msra.mxu0 %v63_v17 }
  0x23   :  { %211 = vmatpush.msra.mxu3 %v109_v22  ;;  %132 = vmatpush.msra.mxu1 %v109_v22 }
  0x24   :  { %197 = vmatpush.msra.mxu2 %v62_v19  ;;  %89 = vmatpush.msra.mxu0 %v62_v19 }
  0x25   :  { %212 = vmatpush.msra.mxu3 %v108_v24  ;;  %133 = vmatpush.msra.mxu1 %v108_v24 }
  0x26   :  { %198 = vmatpush.msra.mxu2 %v61_v21  ;;  %90 = vmatpush.msra.mxu0 %v61_v21 }
  0x27   :  { %213 = vmatpush.msra.mxu3 %v107_v26  ;;  %134 = vmatpush.msra.mxu1 %v107_v26 }
  0x28   :  { %199 = vmatpush.msra.mxu2 %v60_v23  ;;  %91 = vmatpush.msra.mxu0 %v60_v23 }
  0x29   :  { %214 = vmatpush.msra.mxu3 %v106_v30  ;;  %135 = vmatpush.msra.mxu1 %v106_v30 }
  0x2a   :  { %200 = vmatpush.msra.mxu2 %v59_v25  ;;  %92 = vmatpush.msra.mxu0 %v59_v25 }
  0x2b   :  { %215 = vmatpush.msra.mxu3 %v105_v31  ;;  %136 = vmatpush.msra.mxu1 %v105_v31 }
  0x2c   :  { %201 = vmatpush.msra.mxu2 %v58_v27  ;;  %93 = vmatpush.msra.mxu0 %v58_v27 }
  0x2d   :  { %97 = vmatmul.f32.vlgmr.msra.gmra.mxu2 %v57_v28  ;;  %94 = vmatmul.f32.vlgmr.msra.gmra.mxu0 %v56_v29 }
  0x2e   :  { %216 = vmatpush.msra.mxu3 %v104_v32  ;;  %137 = vmatpush.msra.mxu1 %v104_v32 }
  0x30   :  { %217 = vmatpush.msra.mxu3 %v103_v33  ;;  %138 = vmatpush.msra.mxu1 %v103_v33 }
  0xaa   :  { %v95_v35 = vpop.f32.mrf.mxu0 }
  0xab   :  { %v96_v36 = vadd.f32 %v224_v34, %v95_v35 }
  0xad   :  { %101 = vst [vmem:[#allocation8] sm:$0xff] %v96_v36  ;;  %139 = vmatmul.f32.vlgmr.msra.gmra.mxu1 %v96_v36 }
  0xb0   :  { %v98_v37 = vpop.f32.mrf.mxu2 }
  0xb1   :  { %v99_v38 = vadd.f32 %v224_v34, %v98_v37 }
  0xb3   :  { %102 = vst [vmem:[#allocation8 + $0x8] sm:$0xff] %v99_v38  ;;  %142 = vmatmul.f32.vlgmr.msra.gmra.mxu3 %v99_v38 }
  0xb4   :  { %173 = dma.vmem_to_hbm [thread:$0]  %s166_s13, 256, %s168_s16, [#allocation9], %s331_s29, %s331_s29, %s332_s30  }
 0x12a   :  { %v140_v40 = vpop.f32.mrf.mxu1 }
 0x12b   :  { %v141_v41 = vadd.f32 %v225_v39, %v140_v40 }
 0x12d   :  { %146 = vst [vmem:[#allocation7] sm:$0xff] %v141_v41 }
 0x136   :  { %v143_v42 = vpop.f32.mrf.mxu3 }
 0x137   :  { %v144_v43 = vadd.f32 %v225_v39, %v143_v42 }
 0x139   :  { %147 = vst [vmem:[#allocation7 + $0x8] sm:$0xff] %v144_v43 }
 0x13a   :  { %160 = dma.vmem_to_hbm [thread:$0]  %s153_s19, 256, %s155_s22, [#allocation4], %s331_s29, %s331_s29, %s332_s30  }
 0x13b   :  { %326 = dma.done.wait [#allocation4], 256  }
 0x13c   :  { %327 = vsyncadd [#allocation4], 4294967040 }
 0x13d   :  { %328 = dma.done.wait [#allocation9], 256  }
 0x13e   :  { %329 = vsyncadd [#allocation9], 4294967040 }
 0x13f   :  { %182 = vsyncpa [#allocation3], 1 }
 0x140   :  { %183 = vsyncpa [#allocation6], 1 }
 0x141   :  { %184 = vsyncpa [#allocation4], 1 }
 0x142   :  { %185 = vsyncpa [#allocation9], 1 }

</bundles_post_ra>
